<compile_context>
chip_gen: v7x
topology: tpu7x:2x2x1
jax: 0.10.0
libtpu: 0.0.40
codegen_flags: <defaults>
</compile_context>

<pallas_src>
import functools

import jax
import jax.numpy as jnp
from jax.experimental import pallas as pl
from jax.experimental.pallas import tpu as pltpu


# ---------------------------------------------------------------------------
# Kernel
# ---------------------------------------------------------------------------
def _attention_kernel(x_ref, wq_ref, wk_ref, wv_ref, o_ref, *scratch,
                      q_tile, fuse_q, use_bf16):
    # x_ref  : (bt, S, E)   input block
    # wq_ref : (E, E)       (in, out), beta already folded into the columns
    # wk_ref : (E, E)       (in, out)
    # wv_ref : (E, E)       (in, out)
    # o_ref  : (bt, S, E)   output block
    # scratch: optional (bt, S, E) VMEM buffer for the fused Q projection
    bt, seq, emb = x_ref.shape
    n_q_tiles = seq // q_tile
    cdt = jnp.bfloat16 if use_bf16 else jnp.float32
    q_scr = scratch[0] if fuse_q else None

    # Whole weights consumed directly by the dots — no ref slices anywhere.
    wq = wq_ref[...].astype(cdt)
    wk = wk_ref[...].astype(cdt)
    wv = wv_ref[...].astype(cdt)

    # K / V for the whole block in wide MXU passes (M = bt*S).
    x_flat = x_ref[...].astype(cdt).reshape(bt * seq, emb)
    k = jnp.dot(x_flat, wk, preferred_element_type=jnp.float32)
    k = k.astype(cdt).reshape(bt, seq, emb)
    v = jnp.dot(x_flat, wv, preferred_element_type=jnp.float32)
    v = v.astype(cdt).reshape(bt, seq, emb)

    if fuse_q:
        # Single wide Q pass for the whole block, parked in VMEM scratch so the
        # per-tile read is a cheap ref slice (no re-projection per tile).
        q_all = jnp.dot(x_flat, wq, preferred_element_type=jnp.float32)
        q_scr[...] = q_all.astype(q_scr.dtype).reshape(bt, seq, emb)

    if n_q_tiles > 1:
        # Hoist the K relayout out of the q-tile loop: (bt, E, S) puts the
        # contraction dim second-to-last (MXU-natural), so the per-tile score
        # matmul never re-transposes K (XLU cost paid once per grid step).
        k_mat = jnp.swapaxes(k, 1, 2)                     # (bt, E, S)
        score_dn = (((2,), (1,)), ((0,), (0,)))
    else:
        k_mat = k                                         # (bt, S, E)
        score_dn = (((2,), (2,)), ((0,), (0,)))

    def process_tile(row0):
        x_t = x_ref[:, pl.ds(row0, q_tile), :]            # (bt, Tq, E)
        if fuse_q:
            q_t = q_scr[:, pl.ds(row0, q_tile), :]        # (bt, Tq, E), cdt
        else:
            q_t = jnp.dot(
                x_t.astype(cdt).reshape(bt * q_tile, emb), wq,
                preferred_element_type=jnp.float32,
            ).astype(cdt).reshape(bt, q_tile, emb)

        # scores = (beta*Q) @ K^T (beta folded into wq), batched over bt.
        s = jax.lax.dot_general(q_t, k_mat, score_dn,
                                preferred_element_type=jnp.float32)  # (bt,Tq,S)

        # Numerically stable softmax, normalization deferred past A@V.
        s = s - jnp.max(s, axis=-1, keepdims=True)
        p = jnp.exp(s)
        denom = jnp.sum(p, axis=-1, keepdims=True)                   # (bt,Tq,1)

        att = jax.lax.dot_general(
            p.astype(cdt), v,
            dimension_numbers=(((2,), (1,)), ((0,), (0,))),
            preferred_element_type=jnp.float32,
        )                                                            # (bt,Tq,E)

        # Scale after the matmul (linear): bt*Tq*E mults instead of bt*Tq*S.
        inv = pl.reciprocal(denom, approx=True)   # EUP slot, VALU stays free
        inv = inv * (2.0 - denom * inv)           # Newton step (denom >= 1)
        y = att * inv + x_t.astype(jnp.float32)

        # Matches PyTorch: divides by zero only if a row of y is exactly zero.
        inv_norm = jax.lax.rsqrt(jnp.sum(y * y, axis=-1, keepdims=True))
        o_ref[:, pl.ds(row0, q_tile), :] = (y * inv_norm).astype(o_ref.dtype)
        return None

    if n_q_tiles == 1:
        process_tile(0)
    else:
        def body(t, carry):
            process_tile(pl.multiple_of(t * q_tile, q_tile))
            return carry
        # Unrolled short loops give the LLO scheduler cross-iteration
        # visibility (MXU pushes of tile t+1 overlap the softmax tail of t).
        jax.lax.fori_loop(0, n_q_tiles, body, None,
                          unroll=True if n_q_tiles <= 8 else False)


# ---------------------------------------------------------------------------
# VMEM-budget-driven block sizing
# ---------------------------------------------------------------------------
def _vmem_capacity_bytes():
    try:
        info = pltpu.get_tpu_info()
        cap = getattr(info, "vmem_capacity_bytes", None)
        if cap:
            return int(cap)
    except Exception:
        pass
    # Conservative fallback: assume the smallest per-TC VMEM (v7x, 64 MiB).
    return 64 * 1024 * 1024


def _footprint_bytes(bt, seq, emb, q_tile, fuse_q, use_bf16):
    f32 = 4
    c = 2 if use_bf16 else 4
    xio = 2 * (bt * seq * emb * f32) * 2        # x + out, each double-buffered
    w = 3 * emb * emb * f32                     # weights, single-buffered
    kv = 2 * bt * seq * emb * c                 # K and V resident
    qb = bt * seq * emb * c if fuse_q else 0    # fused-Q scratch
    slab = 2 * bt * q_tile * seq * f32          # scores + exp slab
    misc = 6 * bt * q_tile * emb * f32          # att / y / norms headroom
    return xio + w + kv + qb + slab + misc


def _pick_q_tile(seq_len):
    """Full sequence when short; otherwise a 256/128-aligned divisor so the
    MXU M dimension is filled; multiple-of-8 divisor as a last resort."""
    if seq_len <= 512:
        return seq_len
    for t in (256, 128):
        if seq_len % t == 0:
            return t
    for t in range(256, 7, -8):
        if seq_len % t == 0:
            return t
    return seq_len


def _pick_batch_block(batch, seq, emb, q_tile, budget, use_bf16, min_steps=2):
    """Largest batch block that (a) fits the VMEM budget, (b) keeps >= min_steps
    grid steps when possible (pipelining / megacore), (c) keeps bt*S around a
    couple of thousand rows so per-step overhead and weight reuse amortize."""
    divs = [d for d in range(1, batch + 1) if batch % d == 0]
    for fuse_q in (True, False):
        cands = [bt for bt in divs
                 if _footprint_bytes(bt, seq, emb, q_tile, fuse_q, use_bf16) <= budget]
        if not cands:
            continue
        multi = [bt for bt in cands if batch // bt >= min_steps]
        pool = multi if multi else cands
        row_ok = [bt for bt in pool if bt * seq <= 2048]
        bt = max(row_ok) if row_ok else min(pool)
        return bt, fuse_q
    return 1, False   # nothing fits the heuristic budget; let the compiler try


def _const_weight_spec(shape):
    """Constant-index weight tile: fetched once, single-buffered."""
    index_map = lambda b: (0, 0)
    try:
        return pl.BlockSpec(shape, index_map, pipeline_mode=pl.Buffered(1))
    except TypeError:       # older BlockSpec without pipeline_mode
        return pl.BlockSpec(shape, index_map)


# ---------------------------------------------------------------------------
# Wrapper
# ---------------------------------------------------------------------------
def simple_attention_identity(x, wq, wk, wv, beta=1.0, *,
                               q_tile=None, batch_block=None, use_bf16=False):
    """x: (B, S, E); wq/wk/wv: (E, E) nn.Linear-style (out, in) weights."""
    B, S, E = x.shape

    cap = _vmem_capacity_bytes()
    budget = int(cap * 0.70)                 # block-sizing budget with headroom
    vmem_limit = max(int(cap * 0.80), 32 * 1024 * 1024)

    if q_tile is None:
        q_tile = _pick_q_tile(S)
    assert S % q_tile == 0

    if batch_block is None:
        batch_block, fuse_q = _pick_batch_block(B, S, E, q_tile, budget, use_bf16)
    else:
        assert B % batch_block == 0
        fuse_q = _footprint_bytes(batch_block, S, E, q_tile, True, use_bf16) <= budget
    # The fused-Q scratch only pays off when Q would otherwise be re-projected.
    if S // q_tile == 1:
        fuse_q = False

    wdt = jnp.bfloat16 if use_bf16 else jnp.float32
    cdt = wdt
    # nn.Linear weights are (out, in); pre-transpose to (in, out) so the kernel
    # does plain x @ W with no in-kernel transposes. beta folded into Wq
    # (bit-exact for power-of-two beta; otherwise one extra rounding/weight).
    wq_t = (beta * wq).T.astype(wdt)
    wk_t = wk.T.astype(wdt)
    wv_t = wv.T.astype(wdt)

    kernel = functools.partial(_attention_kernel, q_tile=q_tile,
                               fuse_q=fuse_q, use_bf16=use_bf16)
    grid = (B // batch_block,)
    scratch_shapes = [pltpu.VMEM((batch_block, S, E), cdt)] if fuse_q else []

    return pl.pallas_call(
        kernel,
        out_shape=jax.ShapeDtypeStruct((B, S, E), x.dtype),
        grid_spec=pltpu.PrefetchScalarGridSpec(
            num_scalar_prefetch=0,
            grid=grid,
            in_specs=[
                pl.BlockSpec((batch_block, S, E), lambda b: (b, 0, 0)),  # x
                _const_weight_spec((E, E)),                              # Wq*beta
                _const_weight_spec((E, E)),                              # Wk
                _const_weight_spec((E, E)),                              # Wv
            ],
            out_specs=pl.BlockSpec((batch_block, S, E), lambda b: (b, 0, 0)),
            scratch_shapes=scratch_shapes,
        ),
        compiler_params=pltpu.CompilerParams(
            dimension_semantics=("parallel",),
            vmem_limit_bytes=vmem_limit,
        ),
    )(x, wq_t, wk_t, wv_t)


# ---------------------------------------------------------------------------
# Reference + smoke test
# ---------------------------------------------------------------------------
def _reference(x, wq, wk, wv, beta=1.0):
    q = x @ wq.T
    k = x @ wk.T
    v = x @ wv.T
    scores = jnp.einsum("bqe,bke->bqk", q, k)
    attn = jax.nn.softmax(beta * scores, axis=-1)
    attended = jnp.einsum("bqk,bke->bqe", attn, v)
    y = attended + x
    return y / jnp.linalg.norm(y, axis=-1, keepdims=True)


if __name__ == "__main__":
    B, S, E = 2, 8, 32
    beta = 0.5  # power of two -> beta folding is bit-exact vs. the reference

    key = jax.random.PRNGKey(0)
    kx, kq, kk, kv_key = jax.random.split(key, 4)
    x = jax.random.normal(kx, (B, S, E), dtype=jnp.float32)
    # deterministic synthetic nn.Linear weights, shape (out_features, in_features)
    wq = jax.random.normal(kq, (E, E), dtype=jnp.float32) * (1.0 / jnp.sqrt(E))
    wk = jax.random.normal(kk, (E, E), dtype=jnp.float32) * (1.0 / jnp.sqrt(E))
    wv = jax.random.normal(kv_key, (E, E), dtype=jnp.float32) * (1.0 / jnp.sqrt(E))

    fwd = jax.jit(lambda a, b, c, d: simple_attention_identity(a, b, c, d, beta=beta))
    out = jax.block_until_ready(fwd(x, wq, wk, wv))

    ref = _reference(x, wq, wk, wv, beta=beta)
    assert out.shape == (B, S, E)
    max_err = float(jnp.max(jnp.abs(out - ref)))
    assert jnp.allclose(out, ref, atol=1e-5, rtol=1e-5), f"mismatch vs reference: {max_err}"

    print("KERNEL_OK")
</pallas_src>

<mosaic_0001>
module attributes {stable_mosaic.version = 11 : i64} {
  func.func @_attention_kernel(%arg0: i32, %arg1: memref<1x8x32xf32, #tpu.memory_space<vmem>>, %arg2: memref<32x32xf32, #tpu.memory_space<vmem>>, %arg3: memref<32x32xf32, #tpu.memory_space<vmem>>, %arg4: memref<32x32xf32, #tpu.memory_space<vmem>>, %arg5: memref<1x8x32xf32, #tpu.memory_space<vmem>>) attributes {dimension_semantics = [#tpu.dimension_semantics<parallel>], iteration_bounds = array<i64: 2>, scalar_prefetch = 0 : i64, scratch_operands = 0 : i64, tpu.core_type = #tpu.core_type<tc>, window_params = [{transform_indices = @transform_0, window_bounds = array<i64: 1, 8, 32>}, {pipeline_mode = #tpu.pipeline_mode<synchronous>, transform_indices = @transform_1, window_bounds = array<i64: 32, 32>}, {pipeline_mode = #tpu.pipeline_mode<synchronous>, transform_indices = @transform_2, window_bounds = array<i64: 32, 32>}, {pipeline_mode = #tpu.pipeline_mode<synchronous>, transform_indices = @transform_3, window_bounds = array<i64: 32, 32>}, {transform_indices = @transform_4, window_bounds = array<i64: 1, 8, 32>}]} {
    %c0 = arith.constant 0 : index
    %c0_0 = arith.constant 0 : index
    %0 = vector.load %arg2[%c0, %c0_0] : memref<32x32xf32, #tpu.memory_space<vmem>>, vector<32x32xf32>
    %c0_1 = arith.constant 0 : index
    %c0_2 = arith.constant 0 : index
    %1 = vector.load %arg3[%c0_1, %c0_2] : memref<32x32xf32, #tpu.memory_space<vmem>>, vector<32x32xf32>
    %c0_3 = arith.constant 0 : index
    %c0_4 = arith.constant 0 : index
    %2 = vector.load %arg4[%c0_3, %c0_4] : memref<32x32xf32, #tpu.memory_space<vmem>>, vector<32x32xf32>
    %c0_5 = arith.constant 0 : index
    %c0_6 = arith.constant 0 : index
    %c0_7 = arith.constant 0 : index
    %3 = vector.load %arg1[%c0_5, %c0_6, %c0_7] : memref<1x8x32xf32, #tpu.memory_space<vmem>>, vector<1x8x32xf32>
    %4 = vector.shape_cast %3 : vector<1x8x32xf32> to vector<8x32xf32>
    %cst = arith.constant dense<0.000000e+00> : vector<8x32xf32>
    %5 = tpu.matmul %4, %1, %cst {dimension_numbers = #tpu.dot_dimension_numbers<[1], [0], [0], [1], [0, 0, 1, 1], [], []>} : vector<8x32xf32>, vector<32x32xf32>, vector<8x32xf32> -> vector<8x32xf32>
    %6 = vector.shape_cast %5 : vector<8x32xf32> to vector<1x8x32xf32>
    %cst_8 = arith.constant dense<0.000000e+00> : vector<8x32xf32>
    %7 = tpu.matmul %4, %2, %cst_8 {dimension_numbers = #tpu.dot_dimension_numbers<[1], [0], [0], [1], [0, 0, 1, 1], [], []>} : vector<8x32xf32>, vector<32x32xf32>, vector<8x32xf32> -> vector<8x32xf32>
    %8 = vector.shape_cast %7 : vector<8x32xf32> to vector<1x8x32xf32>
    %c0_9 = arith.constant 0 : index
    %c0_10 = arith.constant 0 : index
    %c0_11 = arith.constant 0 : index
    %9 = vector.load %arg1[%c0_9, %c0_10, %c0_11] : memref<1x8x32xf32, #tpu.memory_space<vmem>>, vector<1x8x32xf32>
    %10 = vector.shape_cast %9 : vector<1x8x32xf32> to vector<8x32xf32>
    %cst_12 = arith.constant dense<0.000000e+00> : vector<8x32xf32>
    %11 = tpu.matmul %10, %0, %cst_12 {dimension_numbers = #tpu.dot_dimension_numbers<[1], [0], [0], [1], [0, 0, 1, 1], [], []>} : vector<8x32xf32>, vector<32x32xf32>, vector<8x32xf32> -> vector<8x32xf32>
    %12 = vector.shape_cast %11 : vector<8x32xf32> to vector<1x8x32xf32>
    %cst_13 = arith.constant dense<0.000000e+00> : vector<1x8x8xf32>
    %13 = tpu.matmul %12, %6, %cst_13 {dimension_numbers = #tpu.dot_dimension_numbers<[2], [2], [1], [1], [0, 0, 0, 1, 1, 1], [0], [0]>} : vector<1x8x32xf32>, vector<1x8x32xf32>, vector<1x8x8xf32> -> vector<1x8x8xf32>
    %cst_14 = arith.constant dense<0xFF800000> : vector<1x8xf32>
    %14 = vector.multi_reduction <maximumf>, %13, %cst_14 [2] : vector<1x8x8xf32> to vector<1x8xf32>
    %15 = vector.shape_cast %14 : vector<1x8xf32> to vector<1x8x1xf32>
    %16 = vector.broadcast %15 : vector<1x8x1xf32> to vector<1x8x8xf32>
    %17 = arith.subf %13, %16 : vector<1x8x8xf32>
    %18 = math.exp %17 : vector<1x8x8xf32>
    %cst_15 = arith.constant dense<0.000000e+00> : vector<1x8xf32>
    %19 = vector.multi_reduction <add>, %18, %cst_15 [2] : vector<1x8x8xf32> to vector<1x8xf32>
    %20 = vector.shape_cast %19 : vector<1x8xf32> to vector<1x8x1xf32>
    %cst_16 = arith.constant dense<0.000000e+00> : vector<1x8x32xf32>
    %21 = tpu.matmul %18, %8, %cst_16 {dimension_numbers = #tpu.dot_dimension_numbers<[2], [1], [1], [2], [0, 0, 0, 1, 1, 2], [0], [0]>} : vector<1x8x8xf32>, vector<1x8x32xf32>, vector<1x8x32xf32> -> vector<1x8x32xf32>
    %22 = tpu.reciprocal %20 {approx = true} : vector<1x8x1xf32> -> vector<1x8x1xf32>
    %23 = arith.mulf %20, %22 : vector<1x8x1xf32>
    %cst_17 = arith.constant 2.000000e+00 : f32
    %24 = vector.broadcast %cst_17 : f32 to vector<1x8x1xf32>
    %25 = arith.subf %24, %23 : vector<1x8x1xf32>
    %26 = arith.mulf %22, %25 : vector<1x8x1xf32>
    %27 = vector.broadcast %26 : vector<1x8x1xf32> to vector<1x8x32xf32>
    %28 = arith.mulf %21, %27 : vector<1x8x32xf32>
    %29 = arith.addf %28, %9 : vector<1x8x32xf32>
    %30 = arith.mulf %29, %29 : vector<1x8x32xf32>
    %cst_18 = arith.constant dense<0.000000e+00> : vector<1x8xf32>
    %31 = vector.multi_reduction <add>, %30, %cst_18 [2] : vector<1x8x32xf32> to vector<1x8xf32>
    %32 = vector.shape_cast %31 : vector<1x8xf32> to vector<1x8x1xf32>
    %33 = math.rsqrt %32 : vector<1x8x1xf32>
    %34 = vector.broadcast %33 : vector<1x8x1xf32> to vector<1x8x32xf32>
    %35 = arith.mulf %29, %34 : vector<1x8x32xf32>
    %c0_19 = arith.constant 0 : index
    %c0_20 = arith.constant 0 : index
    %c0_21 = arith.constant 0 : index
    %36 = vector.load %arg5[%c0_19, %c0_20, %c0_21] : memref<1x8x32xf32, #tpu.memory_space<vmem>>, vector<1x8x32xf32>
    tpu.vector_store %arg5[%c0_19, %c0_20, %c0_21], %35 {strides = array<i32>} : memref<1x8x32xf32, #tpu.memory_space<vmem>>, vector<1x8x32xf32>,
    return
  }
  func.func @transform_0(%arg0: i32) -> (i32, i32, i32) {
    %c0_i32 = arith.constant 0 : i32
    %c0_i32_0 = arith.constant 0 : i32
    %c0_i32_1 = arith.constant 0 : i32
    return %arg0, %c0_i32, %c0_i32_0 : i32, i32, i32
  }
  func.func @transform_1(%arg0: i32) -> (i32, i32) {
    %c0_i32 = arith.constant 0 : i32
    %c0_i32_0 = arith.constant 0 : i32
    %c0_i32_1 = arith.constant 0 : i32
    return %c0_i32, %c0_i32_0 : i32, i32
  }
  func.func @transform_2(%arg0: i32) -> (i32, i32) {
    %c0_i32 = arith.constant 0 : i32
    %c0_i32_0 = arith.constant 0 : i32
    %c0_i32_1 = arith.constant 0 : i32
    return %c0_i32, %c0_i32_0 : i32, i32
  }
  func.func @transform_3(%arg0: i32) -> (i32, i32) {
    %c0_i32 = arith.constant 0 : i32
    %c0_i32_0 = arith.constant 0 : i32
    %c0_i32_1 = arith.constant 0 : i32
    return %c0_i32, %c0_i32_0 : i32, i32
  }
  func.func @transform_4(%arg0: i32) -> (i32, i32, i32) {
    %c0_i32 = arith.constant 0 : i32
    %c0_i32_0 = arith.constant 0 : i32
    %c0_i32_1 = arith.constant 0 : i32
    return %arg0, %c0_i32, %c0_i32_0 : i32, i32, i32
  }
}

</mosaic_0001>

<bundles_post_ra>
// kernel: _lambda_.1
= control target key start
LH: loop header
LB: loop body
LE: loop exit
PB: predicated region body
PF: predicated region fallthrough
CT: control target
= control target key end

     0   :  { %9 = vsyncpa [#allocation3], 0  ;;  %s1050_s0 = inlined_call_operand.vmem [shape: f32[2,8,32], index: 0, kind: input, shape index: {}]   ;;  %s1051_s1 = inlined_call_operand.vmem [shape: f32[32,32], index: 1, kind: input, shape index: {}]   ;;  %s1052_s2 = inlined_call_operand.vmem [shape: f32[32,32], index: 2, kind: input, shape index: {}]   ;;  %s1053_s3 = inlined_call_operand.vmem [shape: f32[32,32], index: 3, kind: input, shape index: {}]   ;;  %s1054_s4 = inlined_call_operand.hbm [shape: f32[2,8,32], index: 4, kind: output, shape index: {}]  }
   0x1   :  { %11 = vsyncpa [#allocation3 + $0x1], 0  ;;  %s902_s15 = smov 0   ;;  %s904_s16 = smov 0  }
   0x2   :  { %s906_s17 = smov 0   ;;  %s908_s18 = smov 0  }
   0x3 LB: > { %s923_s19 = sadd.s32 4294967295, %s871_s18   ;;  %s665_s20 = sadd.s32 4294967294, %s871_s18   ;;  %s871_s18 = sphi %s908_s18, %s1060_s18   ;;  %s867_s17 = sphi %s906_s17, %s1059_s17   ;;  %s863_s16 = sphi %s904_s16, %s1058_s16   ;;  %s859_s15 = sphi %s902_s15, %s1057_s15  }
   0x4   : > { %s927_s21 = sadd.s32 1, %s871_s18   ;;  %s113_s22 = sadd.s32 1, %s867_s17 }
   0x5   : > { %s110_s23 = ssub.s32 %s871_s18, %s927_s21  ;;  %p123_p0 = scmp.ne.s32.totalorder %s867_s17, %s863_s16 }
   0x6   : > { %p111_p1 = scmp.eq.s32.totalorder %s110_s23, 0  ;;  %p124_p2 = scmp.eq.s32.totalorder %s923_s19, 1 }
   0x7   : > { %p129_p3 = scmp.ne.s32.totalorder %s863_s16, %s859_s15  ;;  %p130_p4 = scmp.eq.s32.totalorder %s665_s20, 1 }
   0x8   : > { %s938_s24 = scalar_select %p111_p1, %s867_s17, %s113_s22  }
   0x9   : > { %p940_p5 = por %p124_p2, %p123_p0  ;;  %p944_p6 = por %p130_p4, %p129_p3 }
   0xa   : > { %p668_p7 = scmp.ge.s32.totalorder %s871_s18, 1  ;;  %p164_p8 = scmp.lt.s32.totalorder %s871_s18, 3 }
   0xc   : > { %p165_p9 = pnand %p668_p7, %p164_p8 }
   0xd   : > { %v197_v0 = vld [vmem:[%s1052_s2] sm:$0xff] (!%p165_p9)  ;;  %v198_v1 = vld [vmem:[%s1052_s2 + $0x8] sm:$0xff] (!%p165_p9)  ;;  %v199_v2 = vld [vmem:[%s1052_s2 + $0x10] sm:$0xff] (!%p165_p9)  ;;  %v873_v3 = vmov (!%p165_p9), 0.0|0.0   ;;  %vm874_vm0 = vmmov (!%p165_p9), 0   ;;  %v875_v6 = vmov (!%p165_p9), 0.0  }
   0xe   : > { %168 = sbr.rel (%p165_p9) target bundleno = 1004 (0x3ec), region = 36  ;;  %743 = vmatprep.subr.bf16.mxu0 (!%p165_p9), %v873_v3  ;;  %v744_v4 = vpack.c.bf16 (!%p165_p9), %v198_v1, %v197_v0  ;;  %v200_v5 = vld [vmem:[%s1052_s2 + $0x18] sm:$0xff] (!%p165_p9)  ;;  %708 = vmatprep.mubr.msk.f32.mxu0 (!%p165_p9), %vm874_vm0, %v875_v6  ;;  %p189_p10 = scmp.lt.s32.totalorder (!%p165_p9), %s923_s19, 1  ;;  %v201_v7 = vld [vmem:[%s1053_s3] sm:$0xff] (!%p165_p9)  ;;  %v202_v9 = vld [vmem:[%s1053_s3 + $0x8] sm:$0xff] (!%p165_p9)  ;;  %vm206_vm1 = vcmask (!%p165_p9), 261120  }
   0xf   : > { %749 = vmatprep.subr.bf16.mxu1 (!%p165_p9), %v873_v3  ;;  %719 = vmatprep.mubr.msk.f32.mxu1 (!%p165_p9), %vm874_vm0, %v875_v6  ;;  %v747_v8 = vpack.c.bf16 (!%p165_p9), %v200_v5, %v199_v2  ;;  %v203_v10 = vld [vmem:[%s1053_s3 + $0x10] sm:$0xff] (!%p165_p9)  ;;  %v204_v11 = vld [vmem:[%s1053_s3 + $0x18] sm:$0xff] (!%p165_p9)  ;;  %v193_v12 = vld [vmem:[%s1051_s1] sm:$0xff] (!%p165_p9)  ;;  %v750_v14 = vpack.c.bf16 (!%p165_p9), %v202_v9, %v201_v7  ;;  %vm496_vm2 = vcmask (!%p165_p9), 64512   ;;  %s678_s20 = sshll.u32 (!%p165_p9), %s923_s19, 7 }
  0x10   : > { %745 = vmatpush3.bf16.msra.mxu0 (!%p165_p9), %v744_v4  ;;  %v194_v13 = vld [vmem:[%s1051_s1 + $0x8] sm:$0xff] (!%p165_p9)  ;;  %v753_v15 = vpack.c.bf16 (!%p165_p9), %v204_v11, %v203_v10  ;;  %v195_v18 = vld [vmem:[%s1051_s1 + $0x10] sm:$0xff] (!%p165_p9)  ;;  %v196_v19 = vld [vmem:[%s1051_s1 + $0x18] sm:$0xff] (!%p165_p9)  ;;  %s1007_s29 = scalar_lea.hbm (!%p165_p9), %s1054_s4, %s678_s20 }
  0x11   : > { %746 = vmatprep.subr.bf16.mxu0 (!%p165_p9), %v873_v3  ;;  %751 = vmatpush3.bf16.msra.mxu1 (!%p165_p9), %v750_v14  ;;  %v756_v17 = vpack.c.bf16 (!%p165_p9), %v194_v13, %v193_v12  ;;  %v759_v20 = vpack.c.bf16 (!%p165_p9), %v196_v19, %v195_v18 }
  0x12   : > { %752 = vmatprep.subr.bf16.mxu1 (!%p165_p9), %v873_v3 }
  0x14   : > { %748 = vmatpush3.bf16.msra.mxu0 (!%p165_p9), %v747_v8 }
  0x15   : > { %s190_s11 = scalar_select %p189_p10, %s923_s19, 1  ;;  %755 = vmatprep.subr.bf16.mxu0 %v873_v3  ;;  %754 = vmatpush3.bf16.msra.mxu1 %v753_v15 }
  0x16   : > { %733 = vmatprep.subr.mxu1 %v875_v6  ;;  %s876_s19 = smov [#allocation2]  }
  0x17   : > { %s670_s5 = sshll.u32 %s190_s11, 3  ;;  %s186_s11 = sand.u32 1, %s863_s16  }
  0x18   : > { %s192_s8 = scalar_lea.vmem %s1050_s0, %s670_s5  ;;  %s669_s14 = sshll.u32 %s186_s11, 3 }
  0x19   : > { %v205_v16 = vld [vmem:[%s192_s8] sm:$0xff]  ;;  %s188_s22 = scalar_lea.vmem [#allocation2], %s669_s14  ;;  %s593_s30 = scalar_lea.sflag [#allocation3], %s186_s11 }
  0x1a   : > { %709 = vmatmul.mubr.msk.f32.vlgmr.msra.gmra.mrb[0].mxu0 %vm206_vm1, %v205_v16  ;;  %720 = vmatmul.mubr.msk.f32.vlgmr.msra.gmra.mrb[0].mxu1 %vm206_vm1, %v205_v16  ;;  %s606_s23 = sshll.u32 %s188_s22, 4  ;;  %s813_s6 = sshll.u32 %s876_s19, 4  ;;  %s1009_s23 = int_to_ptr.vmem [resolvable:$true] %s606_s23  ;;  %s814_s6 = int_to_ptr.vmem [resolvable:$false] %s813_s6 }
  0x1b   : > { %757 = vmatpush3.bf16.msra.mxu0 %v756_v17  ;;  %730 = vmatprep.mubr.msk.f32.mxu0 %vm874_vm0, %v875_v6  ;;  %s809_s5 = scalar_lea.vmem %s1009_s23, 128  ;;  %s815_s7 = scalar_lea.vmem %s814_s6, 256 }
  0x1c   : > { %758 = vmatprep.subr.bf16.mxu0 %v873_v3  ;;  %735 = vmatprep.mubr.msk.f32.mxu1 %vm874_vm0, %v875_v6  ;;  %p810_p11 = scmp.ne.s32.totalorder %s1009_s23, %s809_s5  ;;  %p816_p0 = scmp.lt.s32.totalorder %s1009_s23, %s814_s6 }
  0x1d   : > { %p817_p1 = scmp.lt.s32.totalorder %s815_s7, %s809_s5 }
  0x1e   : > { %p811_p12 = pnand %p810_p11, %p940_p5 }
  0x1f   : > { %760 = vmatpush3.bf16.msra.mxu0 %v759_v20  ;;  %p818_p2 = por %p817_p1, %p816_p0 }
  0x20   : > { %p812_p13 = pneg %p811_p12 }
  0x22   : > { %731 = vmatmul.mubr.msk.f32.vlgmr.msra.gmra.mrb[2].mxu0 %vm206_vm1, %v205_v16  ;;  %p819_p3 = pnand %p818_p2, %p812_p13 }
  0xed   : > { %v276_v21 = vpop.f32.mrb[0].mxu0  ;;  %v346_v23 = vpop.f32.mrb[0].mxu1 }
  0xee   : > { %v710_v22 = vpop.f32.mrb[1].mxu0  ;;  %734 = vmatpush3.xpose.msk.msra.mxu1 %vm206_vm1, %v276_v21  ;;  %v721_v24 = vpop.f32.mrb[1].mxu1 }
  0xef   : > { %738 = vmatprep.subr.mxu1 %v875_v6 }
  0xf5   : > { %v416_v25 = vpop.f32.mrb[2].mxu0 }
  0xf6   : > { %v732_v26 = vpop.f32.mrb[3].mxu0  ;;  %736 = vmatmul.mubr.msk.f32.vlgmr.msra.gmra.mrb[2].mxu1 %vm206_vm1, %v416_v25 }
  0xf7   : > { %739 = vmatpush3.msra.mxu1 %v346_v23  ;;  %740 = vmatprep.mubr.msk.f32.mxu1 %vm874_vm0, %v875_v6 }
 0x1c9   : > { %v492_v27 = vpop.f32.mrb[2].mxu1 }
 0x1ca   : > { %v737_v28 = vpop.f32.mrb[3].mxu1  ;;  %v497_v29 = vsel %vm496_vm2, %v492_v27, -inf }
 0x1cb   : > { %498 = vmax.xlane.f32.xlu0 %v497_v29 }
 0x258   : > { %v499_v30 = vpop.xlane.xlu0 %498 }
 0x259   : > { %v500_v31 = vsub.f32 %v492_v27, %v499_v30 }
 0x25b   : > { %v501_v32 = vmul.f32 1.442695, %v500_v31 }
 0x25d   : > { %803 = vpow2.f32 %v501_v32 }
 0x267   : > { %v804_v33 = vpop.eup %803 }
 0x268   : > { %741 = vmatmul.mubr.msk.f32.vlgmr.msra.gmra.mrb[4].mxu1 %vm496_vm2, %v804_v33  ;;  %v503_v34 = vsel %vm496_vm2, %v804_v33, 0.0 }
 0x269   : > { %504 = vadd.xlane.f32.xlu0 %v503_v34 }
 0x2f6   : > { %v505_v35 = vpop.xlane.xlu0 %504 }
 0x2f7   : > { %805 = vrcp.f32 %v505_v35 }
 0x301   : > { %v806_v36 = vpop.eup %805 }
 0x302   : > { %v580_v37 = vmul.f32 %v806_v36, %v505_v35 }
 0x304   : > { %v581_v38 = vsub.f32 2.0, %v580_v37 }
 0x306   : > { %v582_v39 = vmul.f32 %v806_v36, %v581_v38 }
 0x33b   : > { %v575_v40 = vpop.f32.mrb[4].mxu1 }
 0x33c   : > { %v583_v41 = vmul.f32 %v582_v39, %v575_v40  ;;  %v742_v42 = vpop.f32.mrb[5].mxu1 }
 0x33e   : > { %v584_v43 = vadd.f32 %v583_v41, %v205_v16 }
 0x340   : > { %v585_v44 = vmul.f32 %v584_v43, %v584_v43 }
 0x342   : > { %v586_v45 = vsel %vm206_vm1, %v585_v44, 0.0 }
 0x343   : > { %587 = vadd.xlane.f32.xlu1 %v586_v45 }
 0x3d0   : > { %v588_v46 = vpop.xlane.xlu1 %587 }
 0x3d1   : > { %807 = vrsqrt.f32 %v588_v46 }
 0x3db   : > { %v808_v47 = vpop.eup %807 }
 0x3dc   : > { %v590_v48 = vmul.f32 %v808_v47, %v584_v43 }
 0x3de   : > { %591 = vst.msk [vmem:[%s188_s22] sm:$0xff] %vm206_vm1, %v590_v48 }
 0x3df   : > { %822 = shalt.err (!%p819_p3)
}
 0x3e0   : > { %s823_s8 = scalar_lea.hbm %s1007_s29, 128  ;;  %s827_s12 = scalar_lea.hbm %s1054_s4, 256 }
 0x3e1   : > { %p824_p4 = scmp.ne.s32.totalorder %s1007_s29, %s823_s8  ;;  %p828_p9 = scmp.lt.u32.totalorder %s1007_s29, %s1054_s4 }
 0x3e2   : > { %p829_p10 = scmp.lt.u32.totalorder %s827_s12, %s823_s8  ;;  %p831_p12 = scmp.lt.u32.totalorder %s823_s8, %s1007_s29 }
 0x3e3   : > { %p825_p7 = pnand %p824_p4, %p940_p5 }
 0x3e4   : > { %p830_p11 = por %p829_p10, %p828_p9 }
 0x3e5   : > { %p826_p8 = pneg %p825_p7 }
 0x3e6   : > { %p832_p13 = por %p831_p12, %p830_p11 }
 0x3e8   : > { %p833_p0 = pnand %p832_p13, %p826_p8 }
 0x3ea   : > { %836 = shalt.err (!%p833_p0)
}
 0x3eb   : > { %761 = dma.vmem_to_hbm [thread:$0]  (%p940_p5), %s1009_s23, 128, %s1007_s29, %s593_s30  }
 0x3ec PF: > { %p767_p1 = scmp.ge.s32.totalorder %s871_s18, 2  ;;  %s618_s14 = sand.u32 1, %s859_s15  }
 0x3ed   : > { %s619_s20 = scalar_lea.sflag [#allocation3], %s618_s14 }
 0x3ee   : > { %p764_p2 = pnand %p767_p1, %p944_p6 }
 0x3f0   : > { %854 = dma.done.wait (!%p764_p2), %s619_s20, 128  }
 0x3f1   : > { %856 = vsyncadd (!%p764_p2), %s619_s20, 4294967168  ;;  %p14_p3 = scmp.ge.s32.totalorder %s927_s21, 4   ;;  %s1057_s15 = smov %s863_s16 }
 0x3f2   : > { %s1058_s16 = smov %s867_s17  ;;  %s1059_s17 = smov %s938_s24 }
 0x3f3   : > { %s1060_s18 = smov %s927_s21  ;;  %16 = sbr.rel (!%p14_p3) target bundleno = 3 (0x3), region = 71 }
 0x3fa   :  { %624 = vsyncpa [#allocation3], 1 }
 0x3fb   :  { %626 = vsyncpa [#allocation3 + $0x1], 1 }

</bundles_post_ra>
